<compile_context>
chip_gen: v7x
topology: tpu7x:2x2x1
jax: 0.10.0
libtpu: 0.0.40
codegen_flags: <defaults>
</compile_context>

<pallas_src>
import functools

import jax
import jax.numpy as jnp
from jax.experimental import pallas as pl
from jax.experimental.pallas import tpu as pltpu


def _pick_default_tm():
    """Per-generation row tile (in packed rows). Trace-time query with safe fallback."""
    tm = 2048
    try:
        info = pltpu.get_tpu_info()
        vmem = int(getattr(info, "vmem_capacity_bytes", 128 << 20))
        if vmem <= (64 << 20):   # v7x: 64 MiB VMEM/TC but 3.2 TB/s HBM -> larger tiles
            tm = 4096
    except Exception:
        pass
    return tm


def _pos_inject_kernel(pos_ref, x_ref, w_ref, b_ref, o_ref):
    # Linear projection on the MXU with f32 accumulation, then additive fusion.
    proj = jnp.dot(x_ref[...], w_ref[...], preferred_element_type=jnp.float32)
    proj = proj + b_ref[...].astype(jnp.float32)              # (tm, dim_p) + (1, dim_p)
    o_ref[...] = (pos_ref[...].astype(jnp.float32) + proj).astype(o_ref.dtype)


@functools.partial(jax.jit, static_argnames=("tm",))
def base_positional_injection(pos, x, weight_t, bias, *, tm=None):
    """Additive positional injection:  pos + x @ weight_t + bias.

    pos:      (N, dim)     positional encodings (identity `_encode`)
    x:        (N, x_dim)   feature embeddings
    weight_t: (x_dim, dim) nn.Linear weight, stored transposed
    bias:     (dim,)
    """
    N, dim = pos.shape
    Nx, x_dim = x.shape
    assert Nx == N
    assert weight_t.shape == (x_dim, dim)
    assert bias.shape == (dim,)
    out_dtype = pos.dtype

    if tm is None:
        tm = _pick_default_tm()
    tm = max(8, (tm // 8) * 8)

    # ---- lane-dense packing: fold P rows into one 128-lane row when dim < 128 ----
    # Only an exact reshape is used (no padding copies); P is a power of two and is
    # reduced until it divides N (worst case P=1 -> masked partial stores, no copies).
    P = 128 // dim if (dim < 128 and 128 % dim == 0) else 1
    while P > 1 and N % P != 0:
        P //= 2
    dim_p, x_dim_p = P * dim, P * x_dim

    if P > 1:
        # Block-diagonal weight: packed_x @ w_blk == per-group x @ weight_t (zero fill
        # is exact, so packed results are bit-compatible row-major data).
        w = jnp.kron(jnp.eye(P, dtype=weight_t.dtype), weight_t)
        b2d = jnp.tile(bias, P).reshape(1, dim_p)
    else:
        w = weight_t
        b2d = bias.reshape(1, dim_p)

    n_rows = N // P
    pos_p = pos.reshape(n_rows, dim_p)       # contiguous fold -> bitcast under jit
    x_p = x.reshape(n_rows, x_dim_p)

    # ---- row-tile / grid selection ----
    if n_rows <= tm:
        tm_eff, grid_m = n_rows, 1           # single full-array block; no forced split
    else:
        tm_eff, grid_m = tm, pl.cdiv(n_rows, tm)   # ragged edge masked by Pallas

    # ---- VMEM budget: double-buffered pos/x/out tiles + resident weight/bias ----
    bpe_pos = jnp.dtype(pos.dtype).itemsize
    bpe_x = jnp.dtype(x.dtype).itemsize
    bpe_out = jnp.dtype(out_dtype).itemsize
    bpe_w = jnp.dtype(w.dtype).itemsize
    tile_bytes = tm_eff * (dim_p * bpe_pos + x_dim_p * bpe_x + dim_p * bpe_out)
    resident = (x_dim_p * dim_p + dim_p) * bpe_w
    needed = 2 * (tile_bytes + resident)     # BlockSpec double-buffers every operand
    vmem_limit = int(min(max(2 * needed, 8 << 20), 32 << 20))

    out_p = pl.pallas_call(
        _pos_inject_kernel,
        out_shape=jax.ShapeDtypeStruct((n_rows, dim_p), out_dtype),
        grid_spec=pltpu.PrefetchScalarGridSpec(
            num_scalar_prefetch=0,
            grid=(grid_m,),
            in_specs=[
                pl.BlockSpec((tm_eff, dim_p), lambda i: (i, 0)),     # pos tile
                pl.BlockSpec((tm_eff, x_dim_p), lambda i: (i, 0)),   # x tile
                pl.BlockSpec((x_dim_p, dim_p), lambda i: (0, 0)),    # weight (grid-invariant)
                pl.BlockSpec((1, dim_p), lambda i: (0, 0)),          # bias (grid-invariant)
            ],
            out_specs=pl.BlockSpec((tm_eff, dim_p), lambda i: (i, 0)),
        ),
        compiler_params=pltpu.CompilerParams(
            dimension_semantics=("parallel",),
            vmem_limit_bytes=vmem_limit,
        ),
    )(pos_p, x_p, w, b2d)

    return out_p.reshape(N, dim)


def reference(pos, x, weight_t, bias):
    return pos + (x @ weight_t + bias)


if __name__ == "__main__":
    key = jax.random.PRNGKey(0)
    k_pos, k_x, k_w, k_b = jax.random.split(key, 4)

    N, x_dim, dim = 128, 32, 32   # 128 points, 32 -> 32 projection

    pos = jax.random.normal(k_pos, (N, dim), dtype=jnp.float32)   # pre-encoded positions
    x = jax.random.normal(k_x, (N, x_dim), dtype=jnp.float32)     # feature embeddings

    # Deterministic nn.Linear(x_dim, dim)-style init: U(-1/sqrt(x_dim), 1/sqrt(x_dim)).
    bound = 1.0 / (x_dim ** 0.5)
    weight_t = jax.random.uniform(k_w, (x_dim, dim), jnp.float32, -bound, bound)
    bias = jax.random.uniform(k_b, (dim,), jnp.float32, -bound, bound)

    out = jax.block_until_ready(base_positional_injection(pos, x, weight_t, bias))
    ref = reference(pos, x, weight_t, bias)
    assert out.shape == (N, dim)
    assert jnp.allclose(out, ref, atol=1e-5, rtol=1e-5), "mismatch vs reference"

    # N divisible by the packing factor but not by the row tile.
    N2 = 1000
    pos2 = jax.random.normal(k_pos, (N2, dim), dtype=jnp.float32)
    x2 = jax.random.normal(k_x, (N2, x_dim), dtype=jnp.float32)
    out2 = jax.block_until_ready(base_positional_injection(pos2, x2, weight_t, bias))
    ref2 = reference(pos2, x2, weight_t, bias)
    assert out2.shape == (N2, dim)
    assert jnp.allclose(out2, ref2, atol=1e-5, rtol=1e-5), "mismatch vs reference (ragged tile)"

    # N not divisible by the packing factor -> unpacked fallback path (no copies either).
    N3 = 1001
    pos3 = jax.random.normal(k_pos, (N3, dim), dtype=jnp.float32)
    x3 = jax.random.normal(k_x, (N3, x_dim), dtype=jnp.float32)
    out3 = jax.block_until_ready(base_positional_injection(pos3, x3, weight_t, bias))
    ref3 = reference(pos3, x3, weight_t, bias)
    assert out3.shape == (N3, dim)
    assert jnp.allclose(out3, ref3, atol=1e-5, rtol=1e-5), "mismatch vs reference (unpacked)"

    print("KERNEL_OK")
</pallas_src>

<mosaic_0001>
module attributes {stable_mosaic.version = 11 : i64} {
  func.func @_pos_inject_kernel(%arg0: i32, %arg1: memref<32x128xf32, #tpu.memory_space<vmem>>, %arg2: memref<32x128xf32, #tpu.memory_space<vmem>>, %arg3: memref<128x128xf32, #tpu.memory_space<vmem>>, %arg4: memref<1x128xf32, #tpu.memory_space<vmem>>, %arg5: memref<32x128xf32, #tpu.memory_space<vmem>>) attributes {dimension_semantics = [#tpu.dimension_semantics<parallel>], iteration_bounds = array<i64: 1>, scalar_prefetch = 0 : i64, scratch_operands = 0 : i64, tpu.core_type = #tpu.core_type<tc>, window_params = [{transform_indices = @transform_0, window_bounds = array<i64: 32, 128>}, {transform_indices = @transform_1, window_bounds = array<i64: 32, 128>}, {pipeline_mode = #tpu.pipeline_mode<synchronous>, transform_indices = @transform_2, window_bounds = array<i64: 128, 128>}, {pipeline_mode = #tpu.pipeline_mode<synchronous>, transform_indices = @transform_3, window_bounds = array<i64: 1, 128>}, {transform_indices = @transform_4, window_bounds = array<i64: 32, 128>}]} {
    %c0 = arith.constant 0 : index
    %c0_0 = arith.constant 0 : index
    %0 = vector.load %arg2[%c0, %c0_0] : memref<32x128xf32, #tpu.memory_space<vmem>>, vector<32x128xf32>
    %c0_1 = arith.constant 0 : index
    %c0_2 = arith.constant 0 : index
    %1 = vector.load %arg3[%c0_1, %c0_2] : memref<128x128xf32, #tpu.memory_space<vmem>>, vector<128x128xf32>
    %cst = arith.constant dense<0.000000e+00> : vector<32x128xf32>
    %2 = tpu.matmul %0, %1, %cst {dimension_numbers = #tpu.dot_dimension_numbers<[1], [0], [0], [1], [0, 0, 1, 1], [], []>} : vector<32x128xf32>, vector<128x128xf32>, vector<32x128xf32> -> vector<32x128xf32>
    %c0_3 = arith.constant 0 : index
    %c0_4 = arith.constant 0 : index
    %3 = vector.load %arg4[%c0_3, %c0_4] : memref<1x128xf32, #tpu.memory_space<vmem>>, vector<1x128xf32>
    %4 = vector.broadcast %3 : vector<1x128xf32> to vector<32x128xf32>
    %5 = arith.addf %2, %4 : vector<32x128xf32>
    %c0_5 = arith.constant 0 : index
    %c0_6 = arith.constant 0 : index
    %6 = vector.load %arg1[%c0_5, %c0_6] : memref<32x128xf32, #tpu.memory_space<vmem>>, vector<32x128xf32>
    %7 = arith.addf %6, %5 : vector<32x128xf32>
    %c0_7 = arith.constant 0 : index
    %c0_8 = arith.constant 0 : index
    %8 = vector.load %arg5[%c0_7, %c0_8] : memref<32x128xf32, #tpu.memory_space<vmem>>, vector<32x128xf32>
    tpu.vector_store %arg5[%c0_7, %c0_8], %7 {strides = array<i32>} : memref<32x128xf32, #tpu.memory_space<vmem>>, vector<32x128xf32>,
    return
  }
  func.func @transform_0(%arg0: i32) -> (i32, i32) {
    %c0_i32 = arith.constant 0 : i32
    %c0_i32_0 = arith.constant 0 : i32
    return %arg0, %c0_i32 : i32, i32
  }
  func.func @transform_1(%arg0: i32) -> (i32, i32) {
    %c0_i32 = arith.constant 0 : i32
    %c0_i32_0 = arith.constant 0 : i32
    return %arg0, %c0_i32 : i32, i32
  }
  func.func @transform_2(%arg0: i32) -> (i32, i32) {
    %c0_i32 = arith.constant 0 : i32
    %c0_i32_0 = arith.constant 0 : i32
    %c0_i32_1 = arith.constant 0 : i32
    return %c0_i32, %c0_i32_0 : i32, i32
  }
  func.func @transform_3(%arg0: i32) -> (i32, i32) {
    %c0_i32 = arith.constant 0 : i32
    %c0_i32_0 = arith.constant 0 : i32
    %c0_i32_1 = arith.constant 0 : i32
    return %c0_i32, %c0_i32_0 : i32, i32
  }
  func.func @transform_4(%arg0: i32) -> (i32, i32) {
    %c0_i32 = arith.constant 0 : i32
    %c0_i32_0 = arith.constant 0 : i32
    return %arg0, %c0_i32 : i32, i32
  }
}

</mosaic_0001>

<bundles_post_ra>
// kernel: tile.8
= control target key start
LH: loop header
LB: loop body
LE: loop exit
PB: predicated region body
PF: predicated region fallthrough
CT: control target
= control target key end

     0   :  { %s22_s0 = inlined_call_operand.vmem [shape: f32[32], index: 0, kind: input, shape index: {}]   ;;  %s23_s1 = inlined_call_operand.vmem [shape: f32[4,32], index: 1, kind: output, shape index: {}]  }
   0x1   :  { %v4_v0 = vld [vmem:[%s22_s0] ss:$0 sm:$0xff] }
   0x2   :  { %5 = vst [vmem:[%s23_s1] sm:$0xf] %v4_v0 }

// kernel: tile.9
= control target key start
LH: loop header
LB: loop body
LE: loop exit
PB: predicated region body
PF: predicated region fallthrough
CT: control target
= control target key end

     0   :  { %vm7_vm0 = vcmask 261120   ;;  %s37_s8 = smov 32   ;;  %s38_s9 = smov 64   ;;  %vm13_vm1 = vcmask 1048320   ;;  %vm19_vm2 = vcmask 785920   ;;  %vm25_vm3 = vcmask 523520   ;;  %s55_s0 = inlined_call_operand.vmem [shape: f32[4,32], index: 0, kind: input, shape index: {}]   ;;  %s56_s1 = inlined_call_operand.vmem [shape: f32[1,128], index: 1, kind: output, shape index: {}]  }
   0x1   :  { %v4_v0 = vld [vmem:[%s55_s0] sm:$0xf]  ;;  %s36_s0 = smov 96  }
   0x2   :  { %5 = vst [vmem:[#allocation1] sm:$0xf] %v4_v0 }
   0x9   :  { %v10_v1 = vld [vmem:[#allocation1 + $0x3] sm:$0x1]   ;;  %v22_v2 = vld [vmem:[#allocation1 + $0x1] sm:$0x1]   ;;  %v6_v3 = vld [vmem:[#allocation1] sm:$0x1]  }
   0xa   :  { %11 = vrot.lane.b32.xlu0 %v10_v1, %s36_s0  ;;  %23 = vrot.lane.b32.xlu1 %v22_v2, %s37_s8  ;;  %v16_v4 = vld [vmem:[#allocation1 + $0x2] sm:$0x1]   ;;  %8 = vst.msk [vmem:[#allocation0] sm:$0x1] %vm7_vm0, %v6_v3  }
   0xe   :  { %17 = vrot.lane.b32.xlu0 %v16_v4, %s38_s9 }
  0x7c   :  { %v12_v5 = vpop.permute.xlu0 %11   ;;  %v24_v6 = vpop.permute.xlu1 %23  }
  0x7d   :  { %14 = vst.msk [vmem:[#allocation0] sm:$0x1] %vm13_vm1, %v12_v5  }
  0x80   :  { %v18_v7 = vpop.permute.xlu0 %17  }
  0x81   :  { %20 = vst.msk [vmem:[#allocation0] sm:$0x1] %vm19_vm2, %v18_v7  }
  0x82   :  { %26 = vst.msk [vmem:[#allocation0] sm:$0x1] %vm25_vm3, %v24_v6  }
  0x89   :  { %v30_v8 = vld [vmem:[#allocation0] sm:$0x1] }
  0x8a   :  { %32 = vst [vmem:[%s56_s1] sm:$0x1] %v30_v8 }

// kernel: base_positional_injection.1
= control target key start
LH: loop header
LB: loop body
LE: loop exit
PB: predicated region body
PF: predicated region fallthrough
CT: control target
= control target key end

     0   :  { %s364_s2 = inlined_call_operand.vmem [shape: f32[128,128], index: 2, kind: input, shape index: {}]   ;;  %s365_s1 = inlined_call_operand.vmem [shape: f32[32,128], index: 1, kind: input, shape index: {}]   ;;  %s366_s3 = inlined_call_operand.vmem [shape: f32[1,128], index: 3, kind: input, shape index: {}]   ;;  %s367_s0 = inlined_call_operand.vmem [shape: f32[32,128], index: 0, kind: input, shape index: {}]   ;;  %s368_s4 = inlined_call_operand.vmem [shape: f32[32,128], index: 4, kind: output, shape index: {}]  }
   0x1   :  { %v21_v0 = vld [vmem:[%s364_s2] sm:$0xff]  ;;  %v22_v1 = vld [vmem:[%s364_s2 + $0x8] sm:$0xff]  ;;  %v23_v2 = vld [vmem:[%s364_s2 + $0x10] sm:$0xff] }
   0x2   :  { %v204_v3 = vpack.c.bf16 %v22_v1, %v21_v0  ;;  %v24_v4 = vld [vmem:[%s364_s2 + $0x18] sm:$0xff]  ;;  %v25_v6 = vld [vmem:[%s364_s2 + $0x20] sm:$0xff]  ;;  %v26_v7 = vld [vmem:[%s364_s2 + $0x28] sm:$0xff] }
   0x3   :  { %v208_v5 = vpack.c.bf16 %v24_v4, %v23_v2  ;;  %v212_v8 = vpack.c.bf16 %v26_v7, %v25_v6  ;;  %v17_v9 = vld [vmem:[%s365_s1] sm:$0xff]  ;;  %v19_v10 = vld [vmem:[%s365_s1 + $0x10] sm:$0xff]  ;;  %v28_v12 = vld [vmem:[%s364_s2 + $0x38] sm:$0xff] }
   0x4   :  { %205 = vmatprep.subr.bf16.mxu0 %v204_v3  ;;  %236 = vmatprep.subr.bf16.mxu1 %v204_v3  ;;  %v27_v11 = vld [vmem:[%s364_s2 + $0x30] sm:$0xff]  ;;  %v29_v14 = vld [vmem:[%s364_s2 + $0x40] sm:$0xff]  ;;  %v30_v15 = vld [vmem:[%s364_s2 + $0x48] sm:$0xff] }
   0x5   :  { %207 = vmatpush3.bf16.msra.mxu0 %v204_v3  ;;  %244 = vmatpush3.bf16.msra.mxu1 %v204_v3  ;;  %v216_v13 = vpack.c.bf16 %v28_v12, %v27_v11  ;;  %v220_v16 = vpack.c.bf16 %v30_v15, %v29_v14  ;;  %v31_v17 = vld [vmem:[%s364_s2 + $0x50] sm:$0xff]  ;;  %v32_v18 = vld [vmem:[%s364_s2 + $0x58] sm:$0xff]  ;;  %v33_v20 = vld [vmem:[%s364_s2 + $0x60] sm:$0xff] }
   0x6   :  { %209 = vmatprep.subr.bf16.mxu0 %v208_v5  ;;  %237 = vmatprep.subr.bf16.mxu1 %v208_v5  ;;  %v224_v19 = vpack.c.bf16 %v32_v18, %v31_v17  ;;  %v34_v21 = vld [vmem:[%s364_s2 + $0x68] sm:$0xff]  ;;  %v35_v23 = vld [vmem:[%s364_s2 + $0x70] sm:$0xff]  ;;  %v36_v24 = vld [vmem:[%s364_s2 + $0x78] sm:$0xff] }
   0x7   :  { %198 = vmatprep.mubr.f32.mxu0 %v17_v9  ;;  %201 = vmatprep.mubr.f32.mxu1 %v19_v10  ;;  %v228_v22 = vpack.c.bf16 %v34_v21, %v33_v20  ;;  %v232_v25 = vpack.c.bf16 %v36_v24, %v35_v23  ;;  %v18_v26 = vld [vmem:[%s365_s1 + $0x8] sm:$0xff]  ;;  %v20_v27 = vld [vmem:[%s365_s1 + $0x18] sm:$0xff]  ;;  %v145_v28 = vld [vmem:[%s366_s3] ss:$0 sm:$0xff] }
   0x8   :  { %v130_v30 = vld [vmem:[%s367_s0 + $0x8] sm:$0xff]  ;;  %v132_v32 = vld [vmem:[%s367_s0 + $0x18] sm:$0xff]  ;;  %v129_v36 = vld [vmem:[%s367_s0] sm:$0xff] }
   0x9   :  { %211 = vmatpush3.bf16.msra.mxu0 %v208_v5  ;;  %245 = vmatpush3.bf16.msra.mxu1 %v208_v5  ;;  %v131_v38 = vld [vmem:[%s367_s0 + $0x10] sm:$0xff] }
   0xa   :  { %213 = vmatprep.subr.bf16.mxu0 %v212_v8  ;;  %238 = vmatprep.subr.bf16.mxu1 %v212_v8 }
   0xd   :  { %215 = vmatpush3.bf16.msra.mxu0 %v212_v8  ;;  %246 = vmatpush3.bf16.msra.mxu1 %v212_v8 }
   0xe   :  { %217 = vmatprep.subr.bf16.mxu0 %v216_v13  ;;  %239 = vmatprep.subr.bf16.mxu1 %v216_v13 }
  0x11   :  { %219 = vmatpush3.bf16.msra.mxu0 %v216_v13  ;;  %247 = vmatpush3.bf16.msra.mxu1 %v216_v13 }
  0x12   :  { %221 = vmatprep.subr.bf16.mxu0 %v220_v16  ;;  %240 = vmatprep.subr.bf16.mxu1 %v220_v16 }
  0x15   :  { %223 = vmatpush3.bf16.msra.mxu0 %v220_v16  ;;  %248 = vmatpush3.bf16.msra.mxu1 %v220_v16 }
  0x16   :  { %225 = vmatprep.subr.bf16.mxu0 %v224_v19  ;;  %241 = vmatprep.subr.bf16.mxu1 %v224_v19 }
  0x19   :  { %227 = vmatpush3.bf16.msra.mxu0 %v224_v19  ;;  %249 = vmatpush3.bf16.msra.mxu1 %v224_v19 }
  0x1a   :  { %229 = vmatprep.subr.bf16.mxu0 %v228_v22  ;;  %242 = vmatprep.subr.bf16.mxu1 %v228_v22 }
  0x1d   :  { %231 = vmatpush3.bf16.msra.mxu0 %v228_v22  ;;  %250 = vmatpush3.bf16.msra.mxu1 %v228_v22 }
  0x1e   :  { %233 = vmatprep.subr.bf16.mxu0 %v232_v25  ;;  %243 = vmatprep.subr.bf16.mxu1 %v232_v25 }
  0x21   :  { %235 = vmatpush3.bf16.msra.mxu0 %v232_v25  ;;  %251 = vmatpush3.bf16.msra.mxu1 %v232_v25 }
  0x24   :  { %199 = vmatmul.mubr.f32.vlgmr.msra.gmra.mrb[0].mxu0 %v18_v26  ;;  %202 = vmatmul.mubr.f32.vlgmr.msra.gmra.mrb[0].mxu1 %v20_v27 }
  0xf7   :  { %v200_v29 = vpop.f32.mrb[0].mxu0  ;;  %v203_v31 = vpop.f32.mrb[0].mxu1 }
  0xf8   :  { %v116_v33 = vadd.f32 %v200_v29, %v145_v28  ;;  %v126_v34 = vadd.f32 %v203_v31, %v145_v28  ;;  %v110_v35 = vpop.f32.mrb[1].mxu0  ;;  %v120_v37 = vpop.f32.mrb[1].mxu1 }
  0xf9   :  { %v111_v39 = vadd.f32 %v145_v28, %v110_v35  ;;  %v121_v40 = vadd.f32 %v145_v28, %v120_v37 }
  0xfa   :  { %v134_v41 = vadd.f32 %v130_v30, %v116_v33  ;;  %v136_v42 = vadd.f32 %v132_v32, %v126_v34 }
  0xfb   :  { %v133_v43 = vadd.f32 %v129_v36, %v111_v39  ;;  %v135_v44 = vadd.f32 %v131_v38, %v121_v40 }
  0xfc   :  { %138 = vst [vmem:[%s368_s4 + $0x8] sm:$0xff] %v134_v41  ;;  %140 = vst [vmem:[%s368_s4 + $0x18] sm:$0xff] %v136_v42 }
  0xfd   :  { %137 = vst [vmem:[%s368_s4] sm:$0xff] %v133_v43  ;;  %139 = vst [vmem:[%s368_s4 + $0x10] sm:$0xff] %v135_v44 }

</bundles_post_ra>
